<compile_context>
chip_gen: v5e
topology: v5e:2x2
jax: 0.10.0
libtpu: 0.0.40
codegen_flags: <defaults>
</compile_context>

<pallas_src>
import functools

import jax
import jax.numpy as jnp
from jax import lax
from jax.experimental import pallas as pl
from jax.experimental.pallas import tpu as pltpu


def lstm_price_kernel(x_ref, wih_ref, whh_ref, b_ref, wlin_ref, blin_ref,
                      out_ref, hlast_ref, *, seq):
    """One sequence per grid step: full LSTM recurrence + final linear.

    x_ref:     (S, I)    input sequence, last batch row only
    wih_ref:   (I, 4H)   W_ih^T, gate columns packed as (i, f, o, g), f32
    whh_ref:   (H, 4H)   W_hh^T, same packing, bf16 (MXU operands only)
    b_ref:     (1, 4H)   b_ih + b_hh, same packing, f32
    wlin_ref:  (H, O)    W_linear^T
    blin_ref:  (1, O)    b_linear
    out_ref:   (S, O)    per-timestep prediction of the LAST batch element
    hlast_ref: (S, H)    VMEM scratch holding h_t per step
    """
    S = seq
    H = whh_ref.shape[0]

    # Hoisted input projection: one well-shaped matmul, bias folded in.
    xproj = (jnp.dot(x_ref[...], wih_ref[...],
                     preferred_element_type=jnp.float32)
             + b_ref[...])                                    # (S, 4H) f32

    # Hoist the recurrent weight load out of the unrolled loop (one vld).
    whh = whh_ref[...]                                        # (H, 4H) bf16

    h = jnp.zeros((1, H), jnp.float32)
    c = jnp.zeros((1, H), jnp.float32)

    # Statically unrolled recurrence (S is a compile-time constant here).
    for t in range(S):
        # bf16 operands, f32 accumulate: single MXU pass on the serial chain.
        gates = xproj[t:t + 1, :] + jnp.dot(
            h.astype(jnp.bfloat16), whh,
            preferred_element_type=jnp.float32)               # (1, 4H) f32

        # Gate packing (i, f, o, g): ONE lane-dense sigmoid + ONE tanh.
        sfo = jax.nn.sigmoid(gates[:, :3 * H])
        i_g = sfo[:, 0:H]
        f_g = sfo[:, H:2 * H]
        o_g = sfo[:, 2 * H:3 * H]
        g_g = jnp.tanh(gates[:, 3 * H:4 * H])

        c = f_g * c + i_g * g_g
        h = o_g * jnp.tanh(c)

        # Off the h/c critical path; avoids S live slices + final concatenate.
        hlast_ref[t:t + 1, :] = h

    # Deferred output linear: one matmul + one store.
    out_ref[...] = (jnp.dot(hlast_ref[...], wlin_ref[...],
                            preferred_element_type=jnp.float32)
                    + blin_ref[...])                           # (S, O)


def lstm_price_forward_batched(xs, packed_params):
    """xs: (N, seq, itemSize, input_no) f32. Returns (N, seq, out_no)."""
    wih_t, whh_bf16, b, wlin_t, blin = packed_params
    n_seq, seq, _batch, input_no = xs.shape
    hidden_no = whh_bf16.shape[0]
    out_no = wlin_t.shape[1]

    # Only predictions[-1] (the last batch row) is ever emitted, and LSTM
    # batch rows are independent: drop the dead B-1 rows before the kernel.
    x_last = xs[:, :, -1, :]                                   # (N, S, I)

    kernel = functools.partial(lstm_price_kernel, seq=seq)
    return pl.pallas_call(
        kernel,
        out_shape=jax.ShapeDtypeStruct((n_seq, seq, out_no), jnp.float32),
        grid=(n_seq,),
        in_specs=[
            pl.BlockSpec((None, seq, input_no), lambda n: (n, 0, 0)),
            pl.BlockSpec((input_no, 4 * hidden_no), lambda n: (0, 0)),
            pl.BlockSpec((hidden_no, 4 * hidden_no), lambda n: (0, 0)),
            pl.BlockSpec((1, 4 * hidden_no), lambda n: (0, 0)),
            pl.BlockSpec((hidden_no, out_no), lambda n: (0, 0)),
            pl.BlockSpec((1, out_no), lambda n: (0, 0)),
        ],
        out_specs=pl.BlockSpec((None, seq, out_no), lambda n: (n, 0, 0)),
        scratch_shapes=[pltpu.VMEM((seq, hidden_no), jnp.float32)],
        compiler_params=pltpu.CompilerParams(
            dimension_semantics=("parallel",)),   # shards across v7x's 2 TCs
    )(x_last, wih_t, whh_bf16, b, wlin_t, blin)


def lstm_price_forward(x, packed_params):
    """x: (seq, itemSize, input_no) f32. Returns (seq, out_no), like forward()."""
    return lstm_price_forward_batched(x[None], packed_params)[0]


# ---------------------------------------------------------------------------
# Parameters: raw PyTorch-layout params + packing for the kernel
# ---------------------------------------------------------------------------
def init_raw_params(key, input_no, hidden_no, out_no):
    """PyTorch-style uniform(-1/sqrt(H), 1/sqrt(H)); gate order (i, f, g, o)."""
    ks = jax.random.split(key, 6)
    s = 1.0 / jnp.sqrt(jnp.float32(hidden_no))
    w_ih = jax.random.uniform(ks[0], (4 * hidden_no, input_no), jnp.float32, -s, s)
    w_hh = jax.random.uniform(ks[1], (4 * hidden_no, hidden_no), jnp.float32, -s, s)
    b_ih = jax.random.uniform(ks[2], (4 * hidden_no,), jnp.float32, -s, s)
    b_hh = jax.random.uniform(ks[3], (4 * hidden_no,), jnp.float32, -s, s)
    w_lin = jax.random.uniform(ks[4], (out_no, hidden_no), jnp.float32, -s, s)
    b_lin = jax.random.uniform(ks[5], (out_no,), jnp.float32, -s, s)
    return w_ih, w_hh, b_ih, b_hh, w_lin, b_lin


def pack_params(raw):
    """Kernel packing: reorder gates (i,f,g,o)->(i,f,o,g), transpose, fuse bias.

    W_hh is stored bf16 (recurrent-matmul operand only); everything that feeds
    the VPU/EUP (biases, elementwise, activations) stays f32 (v5e-safe).
    """
    w_ih, w_hh, b_ih, b_hh, w_lin, b_lin = raw
    hidden_no = w_hh.shape[1]
    out_no = w_lin.shape[0]

    def reorder(m):  # rows are gate-major: (i, f, g, o) -> (i, f, o, g)
        i, f, g, o = jnp.split(m, 4, axis=0)
        return jnp.concatenate([i, f, o, g], axis=0)

    return (reorder(w_ih).T,                                    # (I, 4H) f32
            reorder(w_hh).T.astype(jnp.bfloat16),                # (H, 4H) bf16
            reorder(b_ih + b_hh).reshape(1, 4 * hidden_no),      # (1, 4H) f32
            w_lin.T,                                             # (H, O)  f32
            b_lin.reshape(1, out_no))                            # (1, O)  f32


# ---------------------------------------------------------------------------
# Pure-JAX reference on the RAW (PyTorch gate order) params
# ---------------------------------------------------------------------------
def reference_forward(x, raw):
    w_ih, w_hh, b_ih, b_hh, w_lin, b_lin = raw
    _seq, batch, _ = x.shape
    H = w_hh.shape[1]
    h0 = jnp.zeros((batch, H), jnp.float32)
    c0 = jnp.zeros((batch, H), jnp.float32)

    def step(carry, x_t):
        h, c = carry
        gates = x_t @ w_ih.T + h @ w_hh.T + b_ih + b_hh   # (B, 4H), order i,f,g,o
        i_g = jax.nn.sigmoid(gates[:, 0:H])
        f_g = jax.nn.sigmoid(gates[:, H:2 * H])
        g_g = jnp.tanh(gates[:, 2 * H:3 * H])
        o_g = jax.nn.sigmoid(gates[:, 3 * H:4 * H])
        c_new = f_g * c + i_g * g_g
        h_new = o_g * jnp.tanh(c_new)
        y = h_new @ w_lin.T + b_lin                        # (B, O)
        return (h_new, c_new), y[-1, :]                    # predictions[-1]

    _, outs = lax.scan(step, (h0, c0), x)
    return outs  # (seq, O)


if __name__ == "__main__":
    seq_len = 8
    item_size = 8    # batch (itemSize in the PyTorch module)
    input_no = 4
    hidden_no = 32   # lane-friendly 4H = 128
    out_no = 1

    key = jax.random.PRNGKey(0)
    k_x, k_p, k_xs = jax.random.split(key, 3)
    x = jax.random.normal(k_x, (seq_len, item_size, input_no), jnp.float32)

    raw = init_raw_params(k_p, input_no, hidden_no, out_no)
    packed = pack_params(raw)

    # Single-sequence path (exact semantics of model.forward).
    out = jax.block_until_ready(lstm_price_forward(x, packed))
    ref = reference_forward(x, raw)
    assert out.shape == (seq_len, out_no), out.shape
    # bf16 operands on the recurrent matmul (same rounding the default TPU
    # matmul precision applies); tolerance is loose but still catches any
    # gate-packing / indexing / semantics error by orders of magnitude.
    assert jnp.allclose(out, ref, rtol=2e-2, atol=2e-2), (out, ref)

    # Batched path: several independent sequences in ONE pallas_call
    # (parallel grid axis) to amortize launch/DMA overhead.
    n_seq = 3
    xs = jax.random.normal(k_xs, (n_seq, seq_len, item_size, input_no),
                           jnp.float32)
    outs = jax.block_until_ready(lstm_price_forward_batched(xs, packed))
    refs = jnp.stack([reference_forward(xs[i], raw) for i in range(n_seq)])
    assert outs.shape == (n_seq, seq_len, out_no), outs.shape
    assert jnp.allclose(outs, refs, rtol=2e-2, atol=2e-2), (outs, refs)

    print("KERNEL_OK")
</pallas_src>

<mosaic_0001>
module attributes {stable_mosaic.version = 11 : i64} {
  func.func @lstm_price_kernel(%arg0: i32, %arg1: memref<1x8x4xf32, #tpu.memory_space<vmem>>, %arg2: memref<4x128xf32, #tpu.memory_space<vmem>>, %arg3: memref<32x128xbf16, #tpu.memory_space<vmem>>, %arg4: memref<1x128xf32, #tpu.memory_space<vmem>>, %arg5: memref<32x1xf32, #tpu.memory_space<vmem>>, %arg6: memref<1x1xf32, #tpu.memory_space<vmem>>, %arg7: memref<1x8x1xf32, #tpu.memory_space<vmem>>, %arg8: memref<8x32xf32, #tpu.memory_space<vmem>>) attributes {dimension_semantics = [#tpu.dimension_semantics<parallel>], iteration_bounds = array<i64: 1>, scalar_prefetch = 0 : i64, scratch_operands = 1 : i64, tpu.core_type = #tpu.core_type<tc>, window_params = [{transform_indices = @transform_0, window_bounds = array<i64: 1, 8, 4>}, {pipeline_mode = #tpu.pipeline_mode<synchronous>, transform_indices = @transform_1, window_bounds = array<i64: 4, 128>}, {pipeline_mode = #tpu.pipeline_mode<synchronous>, transform_indices = @transform_2, window_bounds = array<i64: 32, 128>}, {pipeline_mode = #tpu.pipeline_mode<synchronous>, transform_indices = @transform_3, window_bounds = array<i64: 1, 128>}, {pipeline_mode = #tpu.pipeline_mode<synchronous>, transform_indices = @transform_4, window_bounds = array<i64: 32, 1>}, {pipeline_mode = #tpu.pipeline_mode<synchronous>, transform_indices = @transform_5, window_bounds = array<i64: 1, 1>}, {transform_indices = @transform_6, window_bounds = array<i64: 1, 8, 1>}]} {
    %c0 = arith.constant 0 : index
    %c0_0 = arith.constant 0 : index
    %c0_1 = arith.constant 0 : index
    %0 = vector.load %arg1[%c0, %c0_0, %c0_1] : memref<1x8x4xf32, #tpu.memory_space<vmem>>, vector<1x8x4xf32>
    %1 = vector.shape_cast %0 : vector<1x8x4xf32> to vector<8x4xf32>
    %c0_2 = arith.constant 0 : index
    %c0_3 = arith.constant 0 : index
    %2 = vector.load %arg2[%c0_2, %c0_3] : memref<4x128xf32, #tpu.memory_space<vmem>>, vector<4x128xf32>
    %cst = arith.constant dense<0.000000e+00> : vector<8x128xf32>
    %3 = tpu.matmul %1, %2, %cst {dimension_numbers = #tpu.dot_dimension_numbers<[1], [0], [0], [1], [0, 0, 1, 1], [], []>} : vector<8x4xf32>, vector<4x128xf32>, vector<8x128xf32> -> vector<8x128xf32>
    %c0_4 = arith.constant 0 : index
    %c0_5 = arith.constant 0 : index
    %4 = vector.load %arg4[%c0_4, %c0_5] : memref<1x128xf32, #tpu.memory_space<vmem>>, vector<1x128xf32>
    %5 = vector.broadcast %4 : vector<1x128xf32> to vector<8x128xf32>
    %6 = arith.addf %3, %5 : vector<8x128xf32>
    %c0_6 = arith.constant 0 : index
    %c0_7 = arith.constant 0 : index
    %7 = vector.load %arg3[%c0_6, %c0_7] : memref<32x128xbf16, #tpu.memory_space<vmem>>, vector<32x128xbf16>
    %cst_8 = arith.constant 0.000000e+00 : f32
    %8 = vector.broadcast %cst_8 : f32 to vector<1x32xf32>
    %cst_9 = arith.constant 0.000000e+00 : f32
    %9 = vector.broadcast %cst_9 : f32 to vector<1x32xf32>
    %10 = vector.extract_strided_slice %6 {offsets = [0, 0], sizes = [1, 128], strides = [1, 1]} : vector<8x128xf32> to vector<1x128xf32>
    %11 = arith.truncf %8 : vector<1x32xf32> to vector<1x32xbf16>
    %cst_10 = arith.constant dense<0.000000e+00> : vector<1x128xf32>
    %12 = tpu.matmul %11, %7, %cst_10 {dimension_numbers = #tpu.dot_dimension_numbers<[1], [0], [0], [1], [0, 0, 1, 1], [], []>} : vector<1x32xbf16>, vector<32x128xbf16>, vector<1x128xf32> -> vector<1x128xf32>
    %13 = arith.addf %10, %12 : vector<1x128xf32>
    %14 = vector.extract_strided_slice %13 {offsets = [0, 0], sizes = [1, 96], strides = [1, 1]} : vector<1x128xf32> to vector<1x96xf32>
    %15 = arith.negf %14 : vector<1x96xf32>
    %16 = math.exp %15 : vector<1x96xf32>
    %cst_11 = arith.constant 1.000000e+00 : f32
    %17 = vector.broadcast %cst_11 : f32 to vector<1x96xf32>
    %18 = arith.addf %17, %16 : vector<1x96xf32>
    %19 = arith.divf %17, %18 : vector<1x96xf32>
    %20 = vector.extract_strided_slice %19 {offsets = [0, 0], sizes = [1, 32], strides = [1, 1]} : vector<1x96xf32> to vector<1x32xf32>
    %21 = vector.extract_strided_slice %19 {offsets = [0, 32], sizes = [1, 32], strides = [1, 1]} : vector<1x96xf32> to vector<1x32xf32>
    %22 = vector.extract_strided_slice %19 {offsets = [0, 64], sizes = [1, 32], strides = [1, 1]} : vector<1x96xf32> to vector<1x32xf32>
    %23 = vector.extract_strided_slice %13 {offsets = [0, 96], sizes = [1, 32], strides = [1, 1]} : vector<1x128xf32> to vector<1x32xf32>
    %24 = math.tanh %23 : vector<1x32xf32>
    %25 = arith.mulf %21, %9 : vector<1x32xf32>
    %26 = arith.mulf %20, %24 : vector<1x32xf32>
    %27 = arith.addf %25, %26 : vector<1x32xf32>
    %28 = math.tanh %27 : vector<1x32xf32>
    %29 = arith.mulf %22, %28 : vector<1x32xf32>
    %c0_12 = arith.constant 0 : index
    %c0_13 = arith.constant 0 : index
    %30 = vector.load %arg8[%c0_12, %c0_13] : memref<8x32xf32, #tpu.memory_space<vmem>>, vector<1x32xf32>
    tpu.vector_store %arg8[%c0_12, %c0_13], %29 {strides = array<i32>} : memref<8x32xf32, #tpu.memory_space<vmem>>, vector<1x32xf32>,
    %31 = vector.extract_strided_slice %6 {offsets = [1, 0], sizes = [1, 128], strides = [1, 1]} : vector<8x128xf32> to vector<1x128xf32>
    %32 = arith.truncf %29 : vector<1x32xf32> to vector<1x32xbf16>
    %cst_14 = arith.constant dense<0.000000e+00> : vector<1x128xf32>
    %33 = tpu.matmul %32, %7, %cst_14 {dimension_numbers = #tpu.dot_dimension_numbers<[1], [0], [0], [1], [0, 0, 1, 1], [], []>} : vector<1x32xbf16>, vector<32x128xbf16>, vector<1x128xf32> -> vector<1x128xf32>
    %34 = arith.addf %31, %33 : vector<1x128xf32>
    %35 = vector.extract_strided_slice %34 {offsets = [0, 0], sizes = [1, 96], strides = [1, 1]} : vector<1x128xf32> to vector<1x96xf32>
    %36 = arith.negf %35 : vector<1x96xf32>
    %37 = math.exp %36 : vector<1x96xf32>
    %cst_15 = arith.constant 1.000000e+00 : f32
    %38 = vector.broadcast %cst_15 : f32 to vector<1x96xf32>
    %39 = arith.addf %38, %37 : vector<1x96xf32>
    %40 = arith.divf %38, %39 : vector<1x96xf32>
    %41 = vector.extract_strided_slice %40 {offsets = [0, 0], sizes = [1, 32], strides = [1, 1]} : vector<1x96xf32> to vector<1x32xf32>
    %42 = vector.extract_strided_slice %40 {offsets = [0, 32], sizes = [1, 32], strides = [1, 1]} : vector<1x96xf32> to vector<1x32xf32>
    %43 = vector.extract_strided_slice %40 {offsets = [0, 64], sizes = [1, 32], strides = [1, 1]} : vector<1x96xf32> to vector<1x32xf32>
    %44 = vector.extract_strided_slice %34 {offsets = [0, 96], sizes = [1, 32], strides = [1, 1]} : vector<1x128xf32> to vector<1x32xf32>
    %45 = math.tanh %44 : vector<1x32xf32>
    %46 = arith.mulf %42, %27 : vector<1x32xf32>
    %47 = arith.mulf %41, %45 : vector<1x32xf32>
    %48 = arith.addf %46, %47 : vector<1x32xf32>
    %49 = math.tanh %48 : vector<1x32xf32>
    %50 = arith.mulf %43, %49 : vector<1x32xf32>
    %c1 = arith.constant 1 : index
    %c0_16 = arith.constant 0 : index
    %51 = vector.load %arg8[%c1, %c0_16] : memref<8x32xf32, #tpu.memory_space<vmem>>, vector<1x32xf32>
    tpu.vector_store %arg8[%c1, %c0_16], %50 {strides = array<i32>} : memref<8x32xf32, #tpu.memory_space<vmem>>, vector<1x32xf32>,
    %52 = vector.extract_strided_slice %6 {offsets = [2, 0], sizes = [1, 128], strides = [1, 1]} : vector<8x128xf32> to vector<1x128xf32>
    %53 = arith.truncf %50 : vector<1x32xf32> to vector<1x32xbf16>
    %cst_17 = arith.constant dense<0.000000e+00> : vector<1x128xf32>
    %54 = tpu.matmul %53, %7, %cst_17 {dimension_numbers = #tpu.dot_dimension_numbers<[1], [0], [0], [1], [0, 0, 1, 1], [], []>} : vector<1x32xbf16>, vector<32x128xbf16>, vector<1x128xf32> -> vector<1x128xf32>
    %55 = arith.addf %52, %54 : vector<1x128xf32>
    %56 = vector.extract_strided_slice %55 {offsets = [0, 0], sizes = [1, 96], strides = [1, 1]} : vector<1x128xf32> to vector<1x96xf32>
    %57 = arith.negf %56 : vector<1x96xf32>
    %58 = math.exp %57 : vector<1x96xf32>
    %cst_18 = arith.constant 1.000000e+00 : f32
    %59 = vector.broadcast %cst_18 : f32 to vector<1x96xf32>
    %60 = arith.addf %59, %58 : vector<1x96xf32>
    %61 = arith.divf %59, %60 : vector<1x96xf32>
    %62 = vector.extract_strided_slice %61 {offsets = [0, 0], sizes = [1, 32], strides = [1, 1]} : vector<1x96xf32> to vector<1x32xf32>
    %63 = vector.extract_strided_slice %61 {offsets = [0, 32], sizes = [1, 32], strides = [1, 1]} : vector<1x96xf32> to vector<1x32xf32>
    %64 = vector.extract_strided_slice %61 {offsets = [0, 64], sizes = [1, 32], strides = [1, 1]} : vector<1x96xf32> to vector<1x32xf32>
    %65 = vector.extract_strided_slice %55 {offsets = [0, 96], sizes = [1, 32], strides = [1, 1]} : vector<1x128xf32> to vector<1x32xf32>
    %66 = math.tanh %65 : vector<1x32xf32>
    %67 = arith.mulf %63, %48 : vector<1x32xf32>
    %68 = arith.mulf %62, %66 : vector<1x32xf32>
    %69 = arith.addf %67, %68 : vector<1x32xf32>
    %70 = math.tanh %69 : vector<1x32xf32>
    %71 = arith.mulf %64, %70 : vector<1x32xf32>
    %c2 = arith.constant 2 : index
    %c0_19 = arith.constant 0 : index
    %72 = vector.load %arg8[%c2, %c0_19] : memref<8x32xf32, #tpu.memory_space<vmem>>, vector<1x32xf32>
    tpu.vector_store %arg8[%c2, %c0_19], %71 {strides = array<i32>} : memref<8x32xf32, #tpu.memory_space<vmem>>, vector<1x32xf32>,
    %73 = vector.extract_strided_slice %6 {offsets = [3, 0], sizes = [1, 128], strides = [1, 1]} : vector<8x128xf32> to vector<1x128xf32>
    %74 = arith.truncf %71 : vector<1x32xf32> to vector<1x32xbf16>
    %cst_20 = arith.constant dense<0.000000e+00> : vector<1x128xf32>
    %75 = tpu.matmul %74, %7, %cst_20 {dimension_numbers = #tpu.dot_dimension_numbers<[1], [0], [0], [1], [0, 0, 1, 1], [], []>} : vector<1x32xbf16>, vector<32x128xbf16>, vector<1x128xf32> -> vector<1x128xf32>
    %76 = arith.addf %73, %75 : vector<1x128xf32>
    %77 = vector.extract_strided_slice %76 {offsets = [0, 0], sizes = [1, 96], strides = [1, 1]} : vector<1x128xf32> to vector<1x96xf32>
    %78 = arith.negf %77 : vector<1x96xf32>
    %79 = math.exp %78 : vector<1x96xf32>
    %cst_21 = arith.constant 1.000000e+00 : f32
    %80 = vector.broadcast %cst_21 : f32 to vector<1x96xf32>
    %81 = arith.addf %80, %79 : vector<1x96xf32>
    %82 = arith.divf %80, %81 : vector<1x96xf32>
    %83 = vector.extract_strided_slice %82 {offsets = [0, 0], sizes = [1, 32], strides = [1, 1]} : vector<1x96xf32> to vector<1x32xf32>
    %84 = vector.extract_strided_slice %82 {offsets = [0, 32], sizes = [1, 32], strides = [1, 1]} : vector<1x96xf32> to vector<1x32xf32>
    %85 = vector.extract_strided_slice %82 {offsets = [0, 64], sizes = [1, 32], strides = [1, 1]} : vector<1x96xf32> to vector<1x32xf32>
    %86 = vector.extract_strided_slice %76 {offsets = [0, 96], sizes = [1, 32], strides = [1, 1]} : vector<1x128xf32> to vector<1x32xf32>
    %87 = math.tanh %86 : vector<1x32xf32>
    %88 = arith.mulf %84, %69 : vector<1x32xf32>
    %89 = arith.mulf %83, %87 : vector<1x32xf32>
    %90 = arith.addf %88, %89 : vector<1x32xf32>
    %91 = math.tanh %90 : vector<1x32xf32>
    %92 = arith.mulf %85, %91 : vector<1x32xf32>
    %c3 = arith.constant 3 : index
    %c0_22 = arith.constant 0 : index
    %93 = vector.load %arg8[%c3, %c0_22] : memref<8x32xf32, #tpu.memory_space<vmem>>, vector<1x32xf32>
    tpu.vector_store %arg8[%c3, %c0_22], %92 {strides = array<i32>} : memref<8x32xf32, #tpu.memory_space<vmem>>, vector<1x32xf32>,
    %94 = vector.extract_strided_slice %6 {offsets = [4, 0], sizes = [1, 128], strides = [1, 1]} : vector<8x128xf32> to vector<1x128xf32>
    %95 = arith.truncf %92 : vector<1x32xf32> to vector<1x32xbf16>
    %cst_23 = arith.constant dense<0.000000e+00> : vector<1x128xf32>
    %96 = tpu.matmul %95, %7, %cst_23 {dimension_numbers = #tpu.dot_dimension_numbers<[1], [0], [0], [1], [0, 0, 1, 1], [], []>} : vector<1x32xbf16>, vector<32x128xbf16>, vector<1x128xf32> -> vector<1x128xf32>
    %97 = arith.addf %94, %96 : vector<1x128xf32>
    %98 = vector.extract_strided_slice %97 {offsets = [0, 0], sizes = [1, 96], strides = [1, 1]} : vector<1x128xf32> to vector<1x96xf32>
    %99 = arith.negf %98 : vector<1x96xf32>
    %100 = math.exp %99 : vector<1x96xf32>
    %cst_24 = arith.constant 1.000000e+00 : f32
    %101 = vector.broadcast %cst_24 : f32 to vector<1x96xf32>
    %102 = arith.addf %101, %100 : vector<1x96xf32>
    %103 = arith.divf %101, %102 : vector<1x96xf32>
    %104 = vector.extract_strided_slice %103 {offsets = [0, 0], sizes = [1, 32], strides = [1, 1]} : vector<1x96xf32> to vector<1x32xf32>
    %105 = vector.extract_strided_slice %103 {offsets = [0, 32], sizes = [1, 32], strides = [1, 1]} : vector<1x96xf32> to vector<1x32xf32>
    %106 = vector.extract_strided_slice %103 {offsets = [0, 64], sizes = [1, 32], strides = [1, 1]} : vector<1x96xf32> to vector<1x32xf32>
    %107 = vector.extract_strided_slice %97 {offsets = [0, 96], sizes = [1, 32], strides = [1, 1]} : vector<1x128xf32> to vector<1x32xf32>
    %108 = math.tanh %107 : vector<1x32xf32>
    %109 = arith.mulf %105, %90 : vector<1x32xf32>
    %110 = arith.mulf %104, %108 : vector<1x32xf32>
    %111 = arith.addf %109, %110 : vector<1x32xf32>
    %112 = math.tanh %111 : vector<1x32xf32>
    %113 = arith.mulf %106, %112 : vector<1x32xf32>
    %c4 = arith.constant 4 : index
    %c0_25 = arith.constant 0 : index
    %114 = vector.load %arg8[%c4, %c0_25] : memref<8x32xf32, #tpu.memory_space<vmem>>, vector<1x32xf32>
    tpu.vector_store %arg8[%c4, %c0_25], %113 {strides = array<i32>} : memref<8x32xf32, #tpu.memory_space<vmem>>, vector<1x32xf32>,
    %115 = vector.extract_strided_slice %6 {offsets = [5, 0], sizes = [1, 128], strides = [1, 1]} : vector<8x128xf32> to vector<1x128xf32>
    %116 = arith.truncf %113 : vector<1x32xf32> to vector<1x32xbf16>
    %cst_26 = arith.constant dense<0.000000e+00> : vector<1x128xf32>
    %117 = tpu.matmul %116, %7, %cst_26 {dimension_numbers = #tpu.dot_dimension_numbers<[1], [0], [0], [1], [0, 0, 1, 1], [], []>} : vector<1x32xbf16>, vector<32x128xbf16>, vector<1x128xf32> -> vector<1x128xf32>
    %118 = arith.addf %115, %117 : vector<1x128xf32>
    %119 = vector.extract_strided_slice %118 {offsets = [0, 0], sizes = [1, 96], strides = [1, 1]} : vector<1x128xf32> to vector<1x96xf32>
    %120 = arith.negf %119 : vector<1x96xf32>
    %121 = math.exp %120 : vector<1x96xf32>
    %cst_27 = arith.constant 1.000000e+00 : f32
    %122 = vector.broadcast %cst_27 : f32 to vector<1x96xf32>
    %123 = arith.addf %122, %121 : vector<1x96xf32>
    %124 = arith.divf %122, %123 : vector<1x96xf32>
    %125 = vector.extract_strided_slice %124 {offsets = [0, 0], sizes = [1, 32], strides = [1, 1]} : vector<1x96xf32> to vector<1x32xf32>
    %126 = vector.extract_strided_slice %124 {offsets = [0, 32], sizes = [1, 32], strides = [1, 1]} : vector<1x96xf32> to vector<1x32xf32>
    %127 = vector.extract_strided_slice %124 {offsets = [0, 64], sizes = [1, 32], strides = [1, 1]} : vector<1x96xf32> to vector<1x32xf32>
    %128 = vector.extract_strided_slice %118 {offsets = [0, 96], sizes = [1, 32], strides = [1, 1]} : vector<1x128xf32> to vector<1x32xf32>
    %129 = math.tanh %128 : vector<1x32xf32>
    %130 = arith.mulf %126, %111 : vector<1x32xf32>
    %131 = arith.mulf %125, %129 : vector<1x32xf32>
    %132 = arith.addf %130, %131 : vector<1x32xf32>
    %133 = math.tanh %132 : vector<1x32xf32>
    %134 = arith.mulf %127, %133 : vector<1x32xf32>
    %c5 = arith.constant 5 : index
    %c0_28 = arith.constant 0 : index
    %135 = vector.load %arg8[%c5, %c0_28] : memref<8x32xf32, #tpu.memory_space<vmem>>, vector<1x32xf32>
    tpu.vector_store %arg8[%c5, %c0_28], %134 {strides = array<i32>} : memref<8x32xf32, #tpu.memory_space<vmem>>, vector<1x32xf32>,
    %136 = vector.extract_strided_slice %6 {offsets = [6, 0], sizes = [1, 128], strides = [1, 1]} : vector<8x128xf32> to vector<1x128xf32>
    %137 = arith.truncf %134 : vector<1x32xf32> to vector<1x32xbf16>
    %cst_29 = arith.constant dense<0.000000e+00> : vector<1x128xf32>
    %138 = tpu.matmul %137, %7, %cst_29 {dimension_numbers = #tpu.dot_dimension_numbers<[1], [0], [0], [1], [0, 0, 1, 1], [], []>} : vector<1x32xbf16>, vector<32x128xbf16>, vector<1x128xf32> -> vector<1x128xf32>
    %139 = arith.addf %136, %138 : vector<1x128xf32>
    %140 = vector.extract_strided_slice %139 {offsets = [0, 0], sizes = [1, 96], strides = [1, 1]} : vector<1x128xf32> to vector<1x96xf32>
    %141 = arith.negf %140 : vector<1x96xf32>
    %142 = math.exp %141 : vector<1x96xf32>
    %cst_30 = arith.constant 1.000000e+00 : f32
    %143 = vector.broadcast %cst_30 : f32 to vector<1x96xf32>
    %144 = arith.addf %143, %142 : vector<1x96xf32>
    %145 = arith.divf %143, %144 : vector<1x96xf32>
    %146 = vector.extract_strided_slice %145 {offsets = [0, 0], sizes = [1, 32], strides = [1, 1]} : vector<1x96xf32> to vector<1x32xf32>
    %147 = vector.extract_strided_slice %145 {offsets = [0, 32], sizes = [1, 32], strides = [1, 1]} : vector<1x96xf32> to vector<1x32xf32>
    %148 = vector.extract_strided_slice %145 {offsets = [0, 64], sizes = [1, 32], strides = [1, 1]} : vector<1x96xf32> to vector<1x32xf32>
    %149 = vector.extract_strided_slice %139 {offsets = [0, 96], sizes = [1, 32], strides = [1, 1]} : vector<1x128xf32> to vector<1x32xf32>
    %150 = math.tanh %149 : vector<1x32xf32>
    %151 = arith.mulf %147, %132 : vector<1x32xf32>
    %152 = arith.mulf %146, %150 : vector<1x32xf32>
    %153 = arith.addf %151, %152 : vector<1x32xf32>
    %154 = math.tanh %153 : vector<1x32xf32>
    %155 = arith.mulf %148, %154 : vector<1x32xf32>
    %c6 = arith.constant 6 : index
    %c0_31 = arith.constant 0 : index
    %156 = vector.load %arg8[%c6, %c0_31] : memref<8x32xf32, #tpu.memory_space<vmem>>, vector<1x32xf32>
    tpu.vector_store %arg8[%c6, %c0_31], %155 {strides = array<i32>} : memref<8x32xf32, #tpu.memory_space<vmem>>, vector<1x32xf32>,
    %157 = vector.extract_strided_slice %6 {offsets = [7, 0], sizes = [1, 128], strides = [1, 1]} : vector<8x128xf32> to vector<1x128xf32>
    %158 = arith.truncf %155 : vector<1x32xf32> to vector<1x32xbf16>
    %cst_32 = arith.constant dense<0.000000e+00> : vector<1x128xf32>
    %159 = tpu.matmul %158, %7, %cst_32 {dimension_numbers = #tpu.dot_dimension_numbers<[1], [0], [0], [1], [0, 0, 1, 1], [], []>} : vector<1x32xbf16>, vector<32x128xbf16>, vector<1x128xf32> -> vector<1x128xf32>
    %160 = arith.addf %157, %159 : vector<1x128xf32>
    %161 = vector.extract_strided_slice %160 {offsets = [0, 0], sizes = [1, 96], strides = [1, 1]} : vector<1x128xf32> to vector<1x96xf32>
    %162 = arith.negf %161 : vector<1x96xf32>
    %163 = math.exp %162 : vector<1x96xf32>
    %cst_33 = arith.constant 1.000000e+00 : f32
    %164 = vector.broadcast %cst_33 : f32 to vector<1x96xf32>
    %165 = arith.addf %164, %163 : vector<1x96xf32>
    %166 = arith.divf %164, %165 : vector<1x96xf32>
    %167 = vector.extract_strided_slice %166 {offsets = [0, 0], sizes = [1, 32], strides = [1, 1]} : vector<1x96xf32> to vector<1x32xf32>
    %168 = vector.extract_strided_slice %166 {offsets = [0, 32], sizes = [1, 32], strides = [1, 1]} : vector<1x96xf32> to vector<1x32xf32>
    %169 = vector.extract_strided_slice %166 {offsets = [0, 64], sizes = [1, 32], strides = [1, 1]} : vector<1x96xf32> to vector<1x32xf32>
    %170 = vector.extract_strided_slice %160 {offsets = [0, 96], sizes = [1, 32], strides = [1, 1]} : vector<1x128xf32> to vector<1x32xf32>
    %171 = math.tanh %170 : vector<1x32xf32>
    %172 = arith.mulf %168, %153 : vector<1x32xf32>
    %173 = arith.mulf %167, %171 : vector<1x32xf32>
    %174 = arith.addf %172, %173 : vector<1x32xf32>
    %175 = math.tanh %174 : vector<1x32xf32>
    %176 = arith.mulf %169, %175 : vector<1x32xf32>
    %c7 = arith.constant 7 : index
    %c0_34 = arith.constant 0 : index
    %177 = vector.load %arg8[%c7, %c0_34] : memref<8x32xf32, #tpu.memory_space<vmem>>, vector<1x32xf32>
    tpu.vector_store %arg8[%c7, %c0_34], %176 {strides = array<i32>} : memref<8x32xf32, #tpu.memory_space<vmem>>, vector<1x32xf32>,
    %c0_35 = arith.constant 0 : index
    %c0_36 = arith.constant 0 : index
    %178 = vector.load %arg8[%c0_35, %c0_36] : memref<8x32xf32, #tpu.memory_space<vmem>>, vector<8x32xf32>
    %c0_37 = arith.constant 0 : index
    %c0_38 = arith.constant 0 : index
    %179 = vector.load %arg5[%c0_37, %c0_38] : memref<32x1xf32, #tpu.memory_space<vmem>>, vector<32x1xf32>
    %cst_39 = arith.constant dense<0.000000e+00> : vector<8x1xf32>
    %180 = tpu.matmul %178, %179, %cst_39 {dimension_numbers = #tpu.dot_dimension_numbers<[1], [0], [0], [1], [0, 0, 1, 1], [], []>} : vector<8x32xf32>, vector<32x1xf32>, vector<8x1xf32> -> vector<8x1xf32>
    %c0_40 = arith.constant 0 : index
    %c0_41 = arith.constant 0 : index
    %181 = vector.load %arg6[%c0_40, %c0_41] : memref<1x1xf32, #tpu.memory_space<vmem>>, vector<1x1xf32>
    %182 = vector.broadcast %181 : vector<1x1xf32> to vector<8x1xf32>
    %183 = arith.addf %180, %182 : vector<8x1xf32>
    %c0_42 = arith.constant 0 : index
    %c0_43 = arith.constant 0 : index
    %c0_44 = arith.constant 0 : index
    %184 = vector.load %arg7[%c0_42, %c0_43, %c0_44] : memref<1x8x1xf32, #tpu.memory_space<vmem>>, vector<1x8x1xf32>
    %185 = vector.shape_cast %184 : vector<1x8x1xf32> to vector<8x1xf32>
    %186 = vector.shape_cast %183 : vector<8x1xf32> to vector<1x8x1xf32>
    tpu.vector_store %arg7[%c0_42, %c0_43, %c0_44], %186 {strides = array<i32>} : memref<1x8x1xf32, #tpu.memory_space<vmem>>, vector<1x8x1xf32>,
    return
  }
  func.func @transform_0(%arg0: i32) -> (i32, i32, i32) {
    %c0_i32 = arith.constant 0 : i32
    %c0_i32_0 = arith.constant 0 : i32
    %c0_i32_1 = arith.constant 0 : i32
    return %arg0, %c0_i32, %c0_i32_0 : i32, i32, i32
  }
  func.func @transform_1(%arg0: i32) -> (i32, i32) {
    %c0_i32 = arith.constant 0 : i32
    %c0_i32_0 = arith.constant 0 : i32
    %c0_i32_1 = arith.constant 0 : i32
    return %c0_i32, %c0_i32_0 : i32, i32
  }
  func.func @transform_2(%arg0: i32) -> (i32, i32) {
    %c0_i32 = arith.constant 0 : i32
    %c0_i32_0 = arith.constant 0 : i32
    %c0_i32_1 = arith.constant 0 : i32
    return %c0_i32, %c0_i32_0 : i32, i32
  }
  func.func @transform_3(%arg0: i32) -> (i32, i32) {
    %c0_i32 = arith.constant 0 : i32
    %c0_i32_0 = arith.constant 0 : i32
    %c0_i32_1 = arith.constant 0 : i32
    return %c0_i32, %c0_i32_0 : i32, i32
  }
  func.func @transform_4(%arg0: i32) -> (i32, i32) {
    %c0_i32 = arith.constant 0 : i32
    %c0_i32_0 = arith.constant 0 : i32
    %c0_i32_1 = arith.constant 0 : i32
    return %c0_i32, %c0_i32_0 : i32, i32
  }
  func.func @transform_5(%arg0: i32) -> (i32, i32) {
    %c0_i32 = arith.constant 0 : i32
    %c0_i32_0 = arith.constant 0 : i32
    %c0_i32_1 = arith.constant 0 : i32
    return %c0_i32, %c0_i32_0 : i32, i32
  }
  func.func @transform_6(%arg0: i32) -> (i32, i32, i32) {
    %c0_i32 = arith.constant 0 : i32
    %c0_i32_0 = arith.constant 0 : i32
    %c0_i32_1 = arith.constant 0 : i32
    return %arg0, %c0_i32, %c0_i32_0 : i32, i32, i32
  }
}

</mosaic_0001>

<bundles_post_ra>
// kernel: tpu_custom_call.1
= control target key start
LH: loop header
LB: loop body
LE: loop exit
PB: predicated region body
PF: predicated region fallthrough
CT: control target
= control target key end

     0   :  { %vm36_vm0 = vcmask 1043456   ;;  %vm32_vm1 = vcmask 31744   ;;  %v773_v4 = vmov 0   ;;  %vm76_vm6 = vcmask 261120   ;;  %s931_s2 = inlined_call_operand.vmem [shape: bf16[32,128], index: 2, kind: input, shape index: {}]   ;;  %s932_s1 = inlined_call_operand.vmem [shape: f32[4,128], index: 1, kind: input, shape index: {}]   ;;  %s933_s0 = inlined_call_operand.vmem [shape: f32[1,8,4], index: 0, kind: input, shape index: {}]   ;;  %s934_s3 = inlined_call_operand.vmem [shape: f32[1,128], index: 3, kind: input, shape index: {}]   ;;  %s935_s4 = inlined_call_operand.vmem [shape: f32[32,1], index: 4, kind: input, shape index: {}]   ;;  %s936_s5 = inlined_call_operand.<no memory space> [shape: f32[1,1], index: 5, kind: input, shape index: {}]   ;;  %s937_s6 = inlined_call_operand.vmem [shape: f32[1,8,1], index: 6, kind: output, shape index: {}]  }
   0x1   :  { %v703_v0 = vld [vmem:[%s931_s2 + $0x8] sm:$0xff]  ;;  %v27_v1 = vld [vmem:[%s932_s1] sm:$0xf] }
   0x2   :  { %676 = vmatpush.msk.msra.mxu0 %vm36_vm0, %v27_v1  ;;  %v26_v2 = vld [vmem:[%s933_s0] sm:$0xff]  ;;  %86 = vmatpush.bf16.msra.mxu1 %v703_v0 }
   0x3   :  { %v702_v3 = vld [vmem:[%s931_s2] sm:$0xff]  ;;  %677 = vmatmul.msk.f32.vlgmr.msra.gmra.mxu0 %vm32_vm1, %v26_v2  ;;  %150 = vmatpush.bf16.msra.mxu2 %v703_v0  ;;  %s774_s2 = smov 32  }
   0x4   :  { %222 = vmatpush.bf16.msra.mxu3 %v703_v0  ;;  %293 = vmatpush.bf16.msrb.mxu0 %v703_v0  ;;  %v707_v5 = vld [vmem:[%s934_s3] ss:$0 sm:$0xff]  ;;  %s775_s3 = smov 64  }
   0x6   :  { %87 = vmatpush.bf16.msra.mxu1 %v702_v3 }
   0x7   :  { %151 = vmatpush.bf16.msra.mxu2 %v702_v3 }
   0x8   :  { %223 = vmatpush.bf16.msra.mxu3 %v702_v3  ;;  %294 = vmatpush.bf16.msrb.mxu0 %v702_v3 }
   0x9   :  { %88 = vmatmul.bf16.vlgmr.msra.gmra.mxu1 %v773_v4 }
   0xa   :  { %366 = vmatpush.bf16.msrb.mxu1 %v703_v0 }
   0xb   :  { %437 = vmatpush.bf16.msrb.mxu2 %v703_v0 }
   0xc   :  { %510 = vmatpush.bf16.msrb.mxu3 %v703_v0  ;;  %581 = vmatpush.bf16.msra.mxu0 %v703_v0 }
   0xe   :  { %367 = vmatpush.bf16.msrb.mxu1 %v702_v3 }
   0xf   :  { %438 = vmatpush.bf16.msrb.mxu2 %v702_v3 }
  0x10   :  { %511 = vmatpush.bf16.msrb.mxu3 %v702_v3  ;;  %582 = vmatpush.bf16.msra.mxu0 %v702_v3 }
  0x80   :  { %v57_v6 = vpop.f32.mrf.mxu0 }
  0x81   :  { %v826_v7 = vadd.f32 %v707_v5, %v57_v6 }
  0x86   :  { %v89_v8 = vpop.f32.mrf.mxu1 }
  0x87   :  { %v93_v9 = vadd.f32 %v89_v8, %v826_v7 }
  0x89   :  { %709 = vtanh.f32 %v93_v9  ;;  %v686_v12 = vmul.f32 -1.442695, %v93_v9 }
  0x8b   :  { %711 = vpow2.f32 %v686_v12 }
  0x8e   :  { %v91_v10 = vpop.f32.mrf.mxu1 }
  0x8f   :  { %v710_v11 = vpop.eup %709 }
  0x90   :  { %116 = vrot.lane.b32.xlu0 %v710_v11, %s774_s2 }
  0x91   :  { %v712_v13 = vpop.eup %711 }
  0x92   :  { %v97_v14 = vadd.f32 1.0, %v712_v13 }
  0x94   :  { %713 = vrcp.f32 %v97_v14  ;;  %v109_v20 = vand.u32 2147483648, %v97_v14  ;;  %vm103_vm3 = vweird.f32 %v97_v14  ;;  %v107_v21 = vand.u32 2147483647, %v97_v14 }
  0x96   :  { %v110_v23 = vor.u32 1.1754944e-38, %v109_v20  ;;  %vm108_vm5 = vcmp.eq.f32.partialorder %v107_v21, 8.507059e+37 }
  0x9a   :  { %v714_v15 = vpop.eup %713 }
  0x9b   :  { %v99_v16 = vmul.f32 %v714_v15, %v97_v14  ;;  %vm104_vm2 = vweird.f32 %v714_v15 }
  0x9c   :  { %vm105_vm4 = vmor %vm103_vm3, %vm104_vm2 }
  0x9d   :  { %v100_v17 = vsub.f32 1.0, %v99_v16 }
  0x9f   :  { %v101_v18 = vmul.f32 %v714_v15, %v100_v17 }
  0xa1   :  { %v102_v19 = vadd.f32 %v714_v15, %v101_v18 }
  0xa3   :  { %v106_v22 = vsel %vm105_vm4, %v714_v15, %v102_v19 }
  0xa4   :  { %v111_v25 = vsel %vm108_vm5, %v110_v23, %v106_v22 }
  0xa5   :  { %v114_v27 = vmul.f32 0.0, %v111_v25 }
 0x102   :  { %v117_v24 = vpop.permute.xlu0 %116 }
 0x103   :  { %v119_v26 = vmul.f32 %v117_v24, %v111_v25 }
 0x105   :  { %121 = vrot.lane.b32.xlu0 %v119_v26, %s774_s2 }
 0x177   :  { %v122_v28 = vpop.permute.xlu0 %121 }
 0x178   :  { %v124_v29 = vadd.f32 %v122_v28, %v114_v27 }
 0x17a   :  { %715 = vtanh.f32 %v124_v29  ;;  %v182_v55 = vrot.slane %v124_v29, 7 }
 0x180   :  { %v716_v30 = vpop.eup %715 }
 0x181   :  { %127 = vrot.lane.b32.xlu1 %v716_v30, %s774_s2 }
 0x1f3   :  { %v128_v31 = vpop.permute.xlu1 %127 }
 0x1f4   :  { %v832_v32 = vmul.f32 %v128_v31, %v111_v25 }
 0x1f6   :  { %v137_v33 = vpack.c.bf16 %v832_v32, %v832_v32 }
 0x1f8   :  { %139 = vrot.lane.b32.xlu1 %v137_v33, %s775_s3 }
 0x26a   :  { %v140_v34 = vpop.permute.xlu1 %139 }
 0x26b   :  { %687 = vmatmul.msk.bf16.vlgmr.msra.gmra.mxu2 %vm76_vm6, %v140_v34 }
 0x2ee   :  { %v153_v35 = vpop.f32.mrf.mxu2 }
 0x2ef   :  { %v158_v36 = vrot.slane %v153_v35, 7 }
 0x2f1   :  { %v160_v37 = vadd.f32 %v158_v36, %v826_v7 }
 0x2f3   :  { %717 = vtanh.f32 %v160_v37  ;;  %v688_v40 = vmul.f32 -1.442695, %v160_v37 }
 0x2f5   :  { %719 = vpow2.f32 %v688_v40 }
 0x2f6   :  { %v155_v38 = vpop.f32.mrf.mxu2 }
 0x2f9   :  { %v718_v39 = vpop.eup %717 }
 0x2fa   :  { %186 = vrot.lane.b32.xlu2 %v718_v39, %s774_s2 }
 0x2fb   :  { %v720_v41 = vpop.eup %719 }
 0x2fc   :  { %v164_v42 = vadd.f32 1.0, %v720_v41 }
 0x2fe   :  { %721 = vrcp.f32 %v164_v42  ;;  %v176_v48 = vand.u32 2147483648, %v164_v42  ;;  %vm170_vm8 = vweird.f32 %v164_v42  ;;  %v174_v49 = vand.u32 2147483647, %v164_v42 }
 0x300   :  { %v177_v51 = vor.u32 1.1754944e-38, %v176_v48  ;;  %vm175_vm10 = vcmp.eq.f32.partialorder %v174_v49, 8.507059e+37 }
 0x304   :  { %v722_v43 = vpop.eup %721 }
 0x305   :  { %v166_v44 = vmul.f32 %v722_v43, %v164_v42  ;;  %vm171_vm7 = vweird.f32 %v722_v43 }
 0x306   :  { %vm172_vm9 = vmor %vm170_vm8, %vm171_vm7 }
 0x307   :  { %v167_v45 = vsub.f32 1.0, %v166_v44 }
 0x309   :  { %v168_v46 = vmul.f32 %v722_v43, %v167_v45 }
 0x30b   :  { %v169_v47 = vadd.f32 %v722_v43, %v168_v46 }
 0x30d   :  { %v173_v50 = vsel %vm172_vm9, %v722_v43, %v169_v47 }
 0x30e   :  { %v178_v53 = vsel %vm175_vm10, %v177_v51, %v173_v50 }
 0x30f   :  { %v184_v56 = vmul.f32 %v182_v55, %v178_v53 }
 0x354   :  { %v187_v52 = vpop.permute.xlu2 %186 }
 0x355   :  { %v189_v54 = vmul.f32 %v187_v52, %v178_v53 }
 0x357   :  { %191 = vrot.lane.b32.xlu2 %v189_v54, %s774_s2 }
 0x3b1   :  { %v192_v57 = vpop.permute.xlu2 %191 }
 0x3b2   :  { %v194_v58 = vadd.f32 %v192_v57, %v184_v56 }
 0x3b4   :  { %723 = vtanh.f32 %v194_v58  ;;  %v254_v22 = vrot.slane %v194_v58, 7 }
 0x3ba   :  { %v724_v59 = vpop.eup %723 }
 0x3bb   :  { %197 = vrot.lane.b32.xlu0 %v724_v59, %s774_s2 }
 0x42d   :  { %v198_v60 = vpop.permute.xlu0 %197 }
 0x42e   :  { %v842_v61 = vmul.f32 %v198_v60, %v178_v53 }
 0x430   :  { %v207_v62 = vpack.c.bf16 %v842_v61, %v842_v61 }
 0x432   :  { %v209_v63 = vshrl.u32 %v207_v62, 16 }
 0x434   :  { %211 = vrot.lane.b32.xlu1 %v209_v63, %s775_s3 }
 0x4a6   :  { %v212_v0 = vpop.permute.xlu1 %211 }
 0x4a7   :  { %689 = vmatmul.msk.bf16.vlgmr.msra.gmra.mxu3 %vm76_vm6, %v212_v0 }
 0x52a   :  { %v225_v1 = vpop.f32.mrf.mxu3 }
 0x52b   :  { %v230_v2 = vrot.slane %v225_v1, 6 }
 0x52d   :  { %v232_v3 = vadd.f32 %v230_v2, %v826_v7 }
 0x52f   :  { %725 = vtanh.f32 %v232_v3  ;;  %v690_v6 = vmul.f32 -1.442695, %v232_v3 }
 0x531   :  { %727 = vpow2.f32 %v690_v6 }
 0x532   :  { %v227_v4 = vpop.f32.mrf.mxu3 }
 0x535   :  { %v726_v5 = vpop.eup %725 }
 0x536   :  { %258 = vrot.lane.b32.xlu2 %v726_v5, %s774_s2 }
 0x537   :  { %v728_v8 = vpop.eup %727 }
 0x538   :  { %v236_v9 = vadd.f32 1.0, %v728_v8 }
 0x53a   :  { %729 = vrcp.f32 %v236_v9  ;;  %v248_v15 = vand.u32 2147483648, %v236_v9  ;;  %vm242_vm12 = vweird.f32 %v236_v9  ;;  %v246_v16 = vand.u32 2147483647, %v236_v9 }
 0x53c   :  { %v249_v18 = vor.u32 1.1754944e-38, %v248_v15  ;;  %vm247_vm14 = vcmp.eq.f32.partialorder %v246_v16, 8.507059e+37 }
 0x540   :  { %v730_v10 = vpop.eup %729 }
 0x541   :  { %v238_v11 = vmul.f32 %v730_v10, %v236_v9  ;;  %vm243_vm11 = vweird.f32 %v730_v10 }
 0x542   :  { %vm244_vm13 = vmor %vm242_vm12, %vm243_vm11 }
 0x543   :  { %v239_v12 = vsub.f32 1.0, %v238_v11 }
 0x545   :  { %v240_v13 = vmul.f32 %v730_v10, %v239_v12 }
 0x547   :  { %v241_v14 = vadd.f32 %v730_v10, %v240_v13 }
 0x549   :  { %v245_v17 = vsel %vm244_vm13, %v730_v10, %v241_v14 }
 0x54a   :  { %v250_v20 = vsel %vm247_vm14, %v249_v18, %v245_v17 }
 0x54b   :  { %v256_v23 = vmul.f32 %v254_v22, %v250_v20 }
 0x590   :  { %v259_v19 = vpop.permute.xlu2 %258 }
 0x591   :  { %v261_v21 = vmul.f32 %v259_v19, %v250_v20 }
 0x593   :  { %263 = vrot.lane.b32.xlu0 %v261_v21, %s774_s2 }
 0x605   :  { %v264_v24 = vpop.permute.xlu0 %263 }
 0x606   :  { %v266_v25 = vadd.f32 %v264_v24, %v256_v23 }
 0x608   :  { %731 = vtanh.f32 %v266_v25  ;;  %v325_v53 = vrot.slane %v266_v25, 7 }
 0x60e   :  { %v732_v26 = vpop.eup %731 }
 0x60f   :  { %269 = vrot.lane.b32.xlu1 %v732_v26, %s774_s2 }
 0x681   :  { %v270_v27 = vpop.permute.xlu1 %269 }
 0x682   :  { %v852_v28 = vmul.f32 %v270_v27, %v250_v20 }
 0x684   :  { %v279_v29 = vpack.c.bf16 %v852_v28, %v852_v28 }
 0x686   :  { %v281_v30 = vrot.slane %v279_v29, 1 }
 0x688   :  { %282 = vrot.lane.b32.xlu2 %v281_v30, %s775_s3 }
 0x6e2   :  { %v283_v31 = vpop.permute.xlu2 %282 }
 0x6e3   :  { %691 = vmatmul.msk.bf16.vlgmr.msrb.gmra.mxu0 %vm76_vm6, %v283_v31 }
 0x760   :  { %v296_v33 = vpop.f32.mrf.mxu0 }
 0x761   :  { %v301_v34 = vrot.slane %v296_v33, 5 }
 0x763   :  { %v303_v35 = vadd.f32 %v301_v34, %v826_v7 }
 0x765   :  { %733 = vtanh.f32 %v303_v35  ;;  %v692_v38 = vmul.f32 -1.442695, %v303_v35 }
 0x767   :  { %735 = vpow2.f32 %v692_v38 }
 0x768   :  { %v298_v36 = vpop.f32.mrf.mxu0 }
 0x76b   :  { %v734_v37 = vpop.eup %733 }
 0x76c   :  { %329 = vrot.lane.b32.xlu0 %v734_v37, %s774_s2 }
 0x76d   :  { %v736_v39 = vpop.eup %735 }
 0x76e   :  { %v307_v40 = vadd.f32 1.0, %v736_v39 }
 0x770   :  { %737 = vrcp.f32 %v307_v40  ;;  %v319_v46 = vand.u32 2147483648, %v307_v40  ;;  %vm313_vm0 = vweird.f32 %v307_v40  ;;  %v317_v47 = vand.u32 2147483647, %v307_v40 }
 0x772   :  { %v320_v49 = vor.u32 1.1754944e-38, %v319_v46  ;;  %vm318_vm2 = vcmp.eq.f32.partialorder %v317_v47, 8.507059e+37 }
 0x776   :  { %v738_v41 = vpop.eup %737 }
 0x777   :  { %v309_v42 = vmul.f32 %v738_v41, %v307_v40  ;;  %vm314_vm15 = vweird.f32 %v738_v41 }
 0x778   :  { %vm315_vm1 = vmor %vm313_vm0, %vm314_vm15 }
 0x779   :  { %v310_v43 = vsub.f32 1.0, %v309_v42 }
 0x77b   :  { %v311_v44 = vmul.f32 %v738_v41, %v310_v43 }
 0x77d   :  { %v312_v45 = vadd.f32 %v738_v41, %v311_v44 }
 0x77f   :  { %v316_v48 = vsel %vm315_vm1, %v738_v41, %v312_v45 }
 0x780   :  { %v321_v51 = vsel %vm318_vm2, %v320_v49, %v316_v48 }
 0x781   :  { %v327_v54 = vmul.f32 %v325_v53, %v321_v51 }
 0x7de   :  { %v330_v50 = vpop.permute.xlu0 %329 }
 0x7df   :  { %v332_v52 = vmul.f32 %v330_v50, %v321_v51 }
 0x7e1   :  { %334 = vrot.lane.b32.xlu1 %v332_v52, %s774_s2 }
 0x853   :  { %v335_v55 = vpop.permute.xlu1 %334 }
 0x854   :  { %v337_v56 = vadd.f32 %v335_v55, %v327_v54 }
 0x856   :  { %739 = vtanh.f32 %v337_v56  ;;  %v398_v22 = vrot.slane %v337_v56, 7 }
 0x85c   :  { %v740_v57 = vpop.eup %739 }
 0x85d   :  { %340 = vrot.lane.b32.xlu2 %v740_v57, %s774_s2 }
 0x8b7   :  { %v341_v58 = vpop.permute.xlu2 %340 }
 0x8b8   :  { %v862_v59 = vmul.f32 %v341_v58, %v321_v51 }
 0x8ba   :  { %v350_v60 = vpack.c.bf16 %v862_v59, %v862_v59 }
 0x8bc   :  { %v352_v62 = vshrl.u32 %v350_v60, 16 }
 0x8be   :  { %v354_v63 = vrot.slane %v352_v62, 1 }
 0x8c0   :  { %355 = vrot.lane.b32.xlu0 %v354_v63, %s775_s3 }
 0x932   :  { %v356_v0 = vpop.permute.xlu0 %355 }
 0x933   :  { %693 = vmatmul.msk.bf16.vlgmr.msrb.gmra.mxu1 %vm76_vm6, %v356_v0 }
 0x9b0   :  { %v369_v1 = vpop.f32.mrf.mxu1 }
 0x9b1   :  { %v374_v2 = vrot.slane %v369_v1, 4 }
 0x9b3   :  { %v376_v3 = vadd.f32 %v374_v2, %v826_v7 }
 0x9b5   :  { %741 = vtanh.f32 %v376_v3  ;;  %v694_v6 = vmul.f32 -1.442695, %v376_v3 }
 0x9b7   :  { %743 = vpow2.f32 %v694_v6 }
 0x9b8   :  { %v371_v4 = vpop.f32.mrf.mxu1 }
 0x9bb   :  { %v742_v5 = vpop.eup %741 }
 0x9bc   :  { %402 = vrot.lane.b32.xlu1 %v742_v5, %s774_s2 }
 0x9bd   :  { %v744_v8 = vpop.eup %743 }
 0x9be   :  { %v380_v9 = vadd.f32 1.0, %v744_v8 }
 0x9c0   :  { %745 = vrcp.f32 %v380_v9  ;;  %v392_v15 = vand.u32 2147483648, %v380_v9  ;;  %vm386_vm4 = vweird.f32 %v380_v9  ;;  %v390_v16 = vand.u32 2147483647, %v380_v9 }
 0x9c2   :  { %v393_v18 = vor.u32 1.1754944e-38, %v392_v15  ;;  %vm391_vm7 = vcmp.eq.f32.partialorder %v390_v16, 8.507059e+37 }
 0x9c6   :  { %v746_v10 = vpop.eup %745 }
 0x9c7   :  { %v382_v11 = vmul.f32 %v746_v10, %v380_v9  ;;  %vm387_vm3 = vweird.f32 %v746_v10 }
 0x9c8   :  { %vm388_vm5 = vmor %vm386_vm4, %vm387_vm3  ;;  %vm135_vm4 = vcmask 253952  }
 0x9c9   :  { %v383_v12 = vsub.f32 1.0, %v382_v11 }
 0x9cb   :  { %v384_v13 = vmul.f32 %v746_v10, %v383_v12 }
 0x9cd   :  { %v385_v14 = vadd.f32 %v746_v10, %v384_v13 }
 0x9cf   :  { %v389_v17 = vsel %vm388_vm5, %v746_v10, %v385_v14  ;;  %vm348_vm5 = vcmask 257027  }
 0x9d0   :  { %v394_v20 = vsel %vm391_vm7, %v393_v18, %v389_v17  ;;  %vm565_vm7 = vcmask 260102  }
 0x9d1   :  { %v400_v23 = vmul.f32 %v398_v22, %v394_v20 }
 0xa2e   :  { %v403_v19 = vpop.permute.xlu1 %402 }
 0xa2f   :  { %v405_v21 = vmul.f32 %v403_v19, %v394_v20 }
 0xa31   :  { %407 = vrot.lane.b32.xlu2 %v405_v21, %s774_s2 }
 0xa8b   :  { %v408_v24 = vpop.permute.xlu2 %407 }
 0xa8c   :  { %v410_v25 = vadd.f32 %v408_v24, %v400_v23 }
 0xa8e   :  { %747 = vtanh.f32 %v410_v25  ;;  %v469_v54 = vrot.slane %v410_v25, 7 }
 0xa94   :  { %v748_v26 = vpop.eup %747 }
 0xa95   :  { %413 = vrot.lane.b32.xlu0 %v748_v26, %s774_s2 }
 0xb07   :  { %v414_v27 = vpop.permute.xlu0 %413 }
 0xb08   :  { %v872_v29 = vmul.f32 %v414_v27, %v394_v20 }
 0xb0a   :  { %v423_v30 = vpack.c.bf16 %v872_v29, %v872_v29 }
 0xb0c   :  { %v425_v31 = vrot.slane %v423_v30, 2 }
 0xb0e   :  { %426 = vrot.lane.b32.xlu1 %v425_v31, %s775_s3 }
 0xb80   :  { %v427_v33 = vpop.permute.xlu1 %426 }
 0xb81   :  { %695 = vmatmul.msk.bf16.vlgmr.msrb.gmra.mxu2 %vm76_vm6, %v427_v33 }
 0xc04   :  { %v440_v34 = vpop.f32.mrf.mxu2 }
 0xc05   :  { %v445_v35 = vrot.slane %v440_v34, 3 }
 0xc07   :  { %v447_v36 = vadd.f32 %v445_v35, %v826_v7 }
 0xc09   :  { %749 = vtanh.f32 %v447_v36  ;;  %v696_v39 = vmul.f32 -1.442695, %v447_v36 }
 0xc0b   :  { %751 = vpow2.f32 %v696_v39 }
 0xc0c   :  { %v442_v37 = vpop.f32.mrf.mxu2 }
 0xc0f   :  { %v750_v38 = vpop.eup %749 }
 0xc10   :  { %473 = vrot.lane.b32.xlu2 %v750_v38, %s774_s2 }
 0xc11   :  { %v752_v40 = vpop.eup %751 }
 0xc12   :  { %v451_v41 = vadd.f32 1.0, %v752_v40 }
 0xc14   :  { %753 = vrcp.f32 %v451_v41  ;;  %v463_v47 = vand.u32 2147483648, %v451_v41  ;;  %vm457_vm9 = vweird.f32 %v451_v41  ;;  %v461_v48 = vand.u32 2147483647, %v451_v41 }
 0xc16   :  { %v464_v50 = vor.u32 1.1754944e-38, %v463_v47  ;;  %vm462_vm11 = vcmp.eq.f32.partialorder %v461_v48, 8.507059e+37 }
 0xc1a   :  { %v754_v42 = vpop.eup %753 }
 0xc1b   :  { %v453_v43 = vmul.f32 %v754_v42, %v451_v41  ;;  %vm458_vm8 = vweird.f32 %v754_v42 }
 0xc1c   :  { %vm459_vm10 = vmor %vm457_vm9, %vm458_vm8  ;;  %vm205_vm8 = vcmask 254977   ;;  %vm421_vm9 = vcmask 258052  }
 0xc1d   :  { %v454_v44 = vsub.f32 1.0, %v453_v43 }
 0xc1f   :  { %v455_v45 = vmul.f32 %v754_v42, %v454_v44 }
 0xc21   :  { %v456_v46 = vadd.f32 %v754_v42, %v455_v45 }
 0xc23   :  { %v460_v49 = vsel %vm459_vm10, %v754_v42, %v456_v46  ;;  %vm277_vm10 = vcmask 256002  }
 0xc24   :  { %v465_v52 = vsel %vm462_vm11, %v464_v50, %v460_v49  ;;  %vm492_vm11 = vcmask 259077  }
 0xc25   :  { %v471_v55 = vmul.f32 %v469_v54, %v465_v52 }
 0xc6a   :  { %v474_v51 = vpop.permute.xlu2 %473 }
 0xc6b   :  { %v476_v53 = vmul.f32 %v474_v51, %v465_v52 }
 0xc6d   :  { %478 = vrot.lane.b32.xlu0 %v476_v53, %s774_s2 }
 0xcdf   :  { %v479_v56 = vpop.permute.xlu0 %478 }
 0xce0   :  { %v481_v57 = vadd.f32 %v479_v56, %v471_v55 }
 0xce2   :  { %755 = vtanh.f32 %v481_v57  ;;  %v542_v24 = vrot.slane %v481_v57, 7 }
 0xce8   :  { %v756_v58 = vpop.eup %755 }
 0xce9   :  { %484 = vrot.lane.b32.xlu1 %v756_v58, %s774_s2 }
 0xd5b   :  { %v485_v60 = vpop.permute.xlu1 %484 }
 0xd5c   :  { %v882_v62 = vmul.f32 %v485_v60, %v465_v52 }
 0xd5e   :  { %v494_v63 = vpack.c.bf16 %v882_v62, %v882_v62 }
 0xd60   :  { %v496_v0 = vshrl.u32 %v494_v63, 16 }
 0xd62   :  { %v498_v1 = vrot.slane %v496_v0, 2 }
 0xd64   :  { %499 = vrot.lane.b32.xlu2 %v498_v1, %s775_s3 }
 0xdbe   :  { %v500_v2 = vpop.permute.xlu2 %499 }
 0xdbf   :  { %697 = vmatmul.msk.bf16.vlgmr.msrb.gmra.mxu3 %vm76_vm6, %v500_v2  ;;  %v641_v2 = vld [vmem:[%s935_s4 + $0x10] sm:$0xff] }
 0xe42   :  { %v513_v3 = vpop.f32.mrf.mxu3 }
 0xe43   :  { %v518_v4 = vrot.slane %v513_v3, 2 }
 0xe45   :  { %v520_v5 = vadd.f32 %v518_v4, %v826_v7 }
 0xe47   :  { %757 = vtanh.f32 %v520_v5  ;;  %v698_v9 = vmul.f32 -1.442695, %v520_v5 }
 0xe49   :  { %759 = vpow2.f32 %v698_v9 }
 0xe4a   :  { %v515_v6 = vpop.f32.mrf.mxu3 }
 0xe4b   :  { %v639_v6 = vld [vmem:[%s935_s4] sm:$0xff] }
 0xe4d   :  { %v758_v8 = vpop.eup %757 }
 0xe4e   :  { %546 = vrot.lane.b32.xlu0 %v758_v8, %s774_s2  ;;  %v11_v8 = vstv %s936_s5 }
 0xe4f   :  { %v760_v10 = vpop.eup %759  ;;  %12 = vst [vmem:[#allocation3] sm:$0x1] %v11_v8 }
 0xe50   :  { %v524_v11 = vadd.f32 1.0, %v760_v10 }
 0xe52   :  { %761 = vrcp.f32 %v524_v11  ;;  %v536_v17 = vand.u32 2147483648, %v524_v11  ;;  %vm530_vm13 = vweird.f32 %v524_v11  ;;  %v534_v18 = vand.u32 2147483647, %v524_v11 }
 0xe54   :  { %v537_v20 = vor.u32 1.1754944e-38, %v536_v17  ;;  %vm535_vm15 = vcmp.eq.f32.partialorder %v534_v18, 8.507059e+37 }
 0xe58   :  { %v762_v12 = vpop.eup %761 }
 0xe59   :  { %v526_v13 = vmul.f32 %v762_v12, %v524_v11  ;;  %vm531_vm12 = vweird.f32 %v762_v12  ;;  %v708_v11 = vld [vmem:[#allocation3] ss:$0 sm:$0xff] }
 0xe5a   :  { %vm532_vm14 = vmor %vm530_vm13, %vm531_vm12  ;;  %vm636_vm12 = vcmask 261127   ;;  %vm670_vm13 = vcmask 7168  }
 0xe5b   :  { %v527_v14 = vsub.f32 1.0, %v526_v13 }
 0xe5d   :  { %v528_v15 = vmul.f32 %v762_v12, %v527_v14 }
 0xe5f   :  { %v529_v16 = vadd.f32 %v762_v12, %v528_v15 }
 0xe61   :  { %v533_v19 = vsel %vm532_vm14, %v762_v12, %v529_v16 }
 0xe62   :  { %v538_v22 = vsel %vm535_vm15, %v537_v20, %v533_v19 }
 0xe63   :  { %v544_v25 = vmul.f32 %v542_v24, %v538_v22 }
 0xec0   :  { %v547_v21 = vpop.permute.xlu0 %546 }
 0xec1   :  { %v549_v23 = vmul.f32 %v547_v21, %v538_v22 }
 0xec3   :  { %551 = vrot.lane.b32.xlu1 %v549_v23, %s774_s2 }
 0xf35   :  { %v552_v26 = vpop.permute.xlu1 %551 }
 0xf36   :  { %v554_v27 = vadd.f32 %v552_v26, %v544_v25 }
 0xf38   :  { %763 = vtanh.f32 %v554_v27  ;;  %v613_v57 = vrot.slane %v554_v27, 7 }
 0xf3e   :  { %v764_v30 = vpop.eup %763 }
 0xf3f   :  { %557 = vrot.lane.b32.xlu2 %v764_v30, %s774_s2 }
 0xf99   :  { %v558_v31 = vpop.permute.xlu2 %557 }
 0xf9a   :  { %v560_v33 = vmul.f32 %v558_v31, %v538_v22 }
 0xf9c   :  { %v567_v34 = vpack.c.bf16 %v560_v33, %v560_v33 }
 0xf9e   :  { %v569_v35 = vrot.slane %v567_v34, 3 }
 0xfa0   :  { %570 = vrot.lane.b32.xlu0 %v569_v35, %s775_s3 }
0x1012   :  { %v571_v36 = vpop.permute.xlu0 %570 }
0x1013   :  { %699 = vmatmul.msk.bf16.vlgmr.msra.gmra.mxu0 %vm76_vm6, %v571_v36 }
0x1090   :  { %v584_v37 = vpop.f32.mrf.mxu0 }
0x1091   :  { %v589_v38 = vrot.slane %v584_v37, 1 }
0x1093   :  { %v591_v39 = vadd.f32 %v589_v38, %v826_v7 }
0x1095   :  { %765 = vtanh.f32 %v591_v39  ;;  %v700_v42 = vmul.f32 -1.442695, %v591_v39 }
0x1097   :  { %767 = vpow2.f32 %v700_v42 }
0x1098   :  { %v586_v40 = vpop.f32.mrf.mxu0 }
0x109b   :  { %v766_v41 = vpop.eup %765 }
0x109c   :  { %617 = vrot.lane.b32.xlu1 %v766_v41, %s774_s2 }
0x109d   :  { %v768_v43 = vpop.eup %767 }
0x109e   :  { %v595_v44 = vadd.f32 1.0, %v768_v43 }
0x10a0   :  { %769 = vrcp.f32 %v595_v44  ;;  %v607_v49 = vand.u32 2147483648, %v595_v44  ;;  %vm601_vm1 = vweird.f32 %v595_v44  ;;  %v605_v50 = vand.u32 2147483647, %v595_v44 }
0x10a2   :  { %v608_v51 = vor.u32 1.1754944e-38, %v607_v49  ;;  %vm606_vm3 = vcmp.eq.f32.partialorder %v605_v50, 8.507059e+37 }
0x10a4   :  { %132 = vrot.lane.b32.xlu1 %v832_v32, %s775_s3 }
0x10a6   :  { %v770_v45 = vpop.eup %769 }
0x10a7   :  { %v597_v7 = vmul.f32 %v770_v45, %v595_v44  ;;  %vm602_vm0 = vweird.f32 %v770_v45 }
0x10a8   :  { %vm603_vm2 = vmor %vm601_vm1, %vm602_vm0 }
0x10a9   :  { %v598_v46 = vsub.f32 1.0, %v597_v7 }
0x10ab   :  { %v599_v47 = vmul.f32 %v770_v45, %v598_v46 }
0x10ac   :  { %345 = vrot.lane.b32.xlu1 %v862_v59, %s775_s3 }
0x10ad   :  { %v600_v48 = vadd.f32 %v770_v45, %v599_v47 }
0x10af   :  { %v604_v32 = vsel %vm603_vm2, %v770_v45, %v600_v48 }
0x10b0   :  { %v609_v52 = vsel %vm606_vm3, %v608_v51, %v604_v32 }
0x10b1   :  { %v615_v58 = vmul.f32 %v613_v57, %v609_v52 }
0x10b4   :  { %562 = vrot.lane.b32.xlu1 %v560_v33, %s775_s3 }
0x110e   :  { %v618_v59 = vpop.permute.xlu1 %617 }
0x110f   :  { %v620_v53 = vmul.f32 %v618_v59, %v609_v52 }
0x1111   :  { %622 = vrot.lane.b32.xlu2 %v620_v53, %s774_s2 }
0x1116   :  { %v133_v54 = vpop.permute.xlu1 %132 }
0x1117   :  { %136 = vst.msk [vmem:[#allocation2] sm:$0x1] %vm135_vm4, %v133_v54 }
0x1119   :  { %202 = vrot.lane.b32.xlu2 %v842_v61, %s775_s3 }
0x111e   :  { %v346_v55 = vpop.permute.xlu1 %345 }
0x111f   :  { %349 = vst.msk [vmem:[#allocation2] sm:$0x8] %vm348_vm5, %v346_v55 }
0x1121   :  { %418 = vrot.lane.b32.xlu2 %v872_v29, %s775_s3  ;;  %v642_v29 = vld [vmem:[%s935_s4 + $0x18] sm:$0xff] }
0x1122   :  { %662 = vmatpush.msra.mxu1 %v642_v29 }
0x1124   :  { %663 = vmatpush.msra.mxu1 %v641_v2 }
0x1126   :  { %v563_v56 = vpop.permute.xlu1 %562 }
0x1127   :  { %566 = vst.msk [vmem:[#allocation2] sm:$0x40] %vm565_vm7, %v563_v56 }
0x116b   :  { %v623_v60 = vpop.permute.xlu2 %622 }
0x116c   :  { %v625_v63 = vadd.f32 %v623_v60, %v615_v58 }
0x116e   :  { %771 = vtanh.f32 %v625_v63 }
0x1173   :  { %v203_v0 = vpop.permute.xlu2 %202 }
0x1174   :  { %v772_v1 = vpop.eup %771  ;;  %206 = vst.msk [vmem:[#allocation2] sm:$0x2] %vm205_vm8, %v203_v0 }
0x1175   :  { %628 = vrot.lane.b32.xlu0 %v772_v1, %s774_s2 }
0x117b   :  { %v419_v61 = vpop.permute.xlu2 %418 }
0x117c   :  { %422 = vst.msk [vmem:[#allocation2] sm:$0x10] %vm421_vm9, %v419_v61 }
0x117d   :  { %274 = vrot.lane.b32.xlu0 %v852_v28, %s775_s3 }
0x1185   :  { %489 = vrot.lane.b32.xlu0 %v882_v62, %s775_s3  ;;  %v640_v62 = vld [vmem:[%s935_s4 + $0x8] sm:$0xff] }
0x1186   :  { %664 = vmatpush.msra.mxu1 %v640_v62 }
0x1188   :  { %665 = vmatpush.msra.mxu1 %v639_v6 }
0x11e7   :  { %v629_v3 = vpop.permute.xlu0 %628 }
0x11e8   :  { %v631_v4 = vmul.f32 %v629_v3, %v609_v52 }
0x11ea   :  { %633 = vrot.lane.b32.xlu2 %v631_v4, %s775_s3 }
0x11ef   :  { %v275_v5 = vpop.permute.xlu0 %274 }
0x11f0   :  { %278 = vst.msk [vmem:[#allocation2] sm:$0x4] %vm277_vm10, %v275_v5 }
0x11f7   :  { %v490_v28 = vpop.permute.xlu0 %489 }
0x11f8   :  { %493 = vst.msk [vmem:[#allocation2] sm:$0x20] %vm492_vm11, %v490_v28 }
0x1244   :  { %v634_v9 = vpop.permute.xlu2 %633 }
0x1245   :  { %637 = vst.msk [vmem:[#allocation2] sm:$0x80] %vm636_vm12, %v634_v9 }
0x124c   :  { %v638_v10 = vld [vmem:[#allocation2] sm:$0xff] }
0x124d   :  { %701 = vmatmul.msk.f32.vlgmr.msra.gmra.mxu1 %vm76_vm6, %v638_v10 }
0x12ca   :  { %v667_v12 = vpop.f32.mrf.mxu1 }
0x12cb   :  { %v668_v13 = vadd.f32 %v708_v11, %v667_v12 }
0x12cd   :  { %671 = vst.msk [vmem:[%s937_s6] sm:$0xff] %vm670_vm13, %v668_v13 }

</bundles_post_ra>
